<compile_context>
chip_gen: v7x
topology: tpu7x:2x2x1
jax: 0.10.0
libtpu: 0.0.40
codegen_flags: <defaults>
</compile_context>

<pallas_src>
import functools

import jax
import jax.numpy as jnp
from jax.experimental import pallas as pl
from jax.experimental.pallas import tpu as pltpu


def _round_up(n, m):
    return ((n + m - 1) // m) * m


# ----------------------------- Pallas kernel ------------------------------ #

def actor_critic_kernel(x_ref, w1_ref, b1_ref, wh_ref, bh_ref, out_ref, *,
                        num_actions):
    # ---- fc1 + ReLU: bf16 MXU operands, f32 accumulate, f32 elementwise ----
    xb = x_ref[...].astype(w1_ref.dtype)                        # [TB, F] bf16
    h = jnp.dot(xb, w1_ref[...], preferred_element_type=jnp.float32)
    h = jnp.maximum(h + b1_ref[...], 0.0)                       # [TB, H_pad] f32

    # ---- fused actor|critic head (f32 resident weights, one MXU pass) -----
    raw = jnp.dot(h, wh_ref[...], preferred_element_type=jnp.float32)
    raw = raw + bh_ref[...]                                     # [TB, OUT_PAD] f32
    # cols 0..A-1 = action logits, col A = state value, cols A+1.. = exact 0

    # ---- masked full-width softmax over the action columns (f32 VPU/EUP) --
    col = jax.lax.broadcasted_iota(jnp.int32, raw.shape, dimension=1)
    is_action = col < num_actions
    masked = jnp.where(is_action, raw, jnp.float32(-1e30))
    m = jnp.max(masked, axis=-1, keepdims=True)
    e = jnp.where(is_action, jnp.exp(masked - m), 0.0)
    denom = jnp.sum(e, axis=-1, keepdims=True)
    probs = e / denom            # exact divide: log-prob / entropy safe downstream

    # probs in action cols, raw (value / zeros) elsewhere; store only the
    # narrow [TB, OUT_STORE] window -> ~16x less HBM writeback than 128 lanes.
    fused = jnp.where(is_action, probs, raw)
    out_ref[...] = fused[:, :out_ref.shape[1]].astype(out_ref.dtype)


# ------------------------------- wrappers ---------------------------------- #

def _xla_forward(x, w1p, b1p, whp, bhp, num_actions):
    """Fused XLA path for tiny batches (1-2 grid steps of pure launch cost)."""
    h = jnp.maximum(
        jnp.dot(x.astype(w1p.dtype), w1p, preferred_element_type=jnp.float32)
        + b1p, 0.0)
    raw = jnp.dot(h, whp, preferred_element_type=jnp.float32) + bhp
    probs = jax.nn.softmax(raw[:, :num_actions], axis=-1)
    values = raw[:, num_actions:num_actions + 1]
    return probs, values


def _choose_tiles(B, max_batch_tile, megacore_batch):
    """Equalized batch tiles; >=2 (even) steps at large B so v7x's 2nd TC works."""
    n_steps = max(1, pl.cdiv(B, max_batch_tile))
    if B >= megacore_batch and n_steps < 2:
        n_steps = 2
    if n_steps > 1 and n_steps % 2 == 1:
        n_steps += 1
    tb = _round_up(pl.cdiv(B, n_steps), 8)
    return tb, tb * n_steps, n_steps


def actor_critic_forward(x, w1p, b1p, whp, bhp, num_actions, *,
                         max_batch_tile=2048, megacore_batch=1024,
                         xla_batch_threshold=512):
    """x: [B, F] float32. Packed params from pack_params(). Returns (probs, values)."""
    B, F = x.shape
    OUT_PAD = whp.shape[1]
    out_w = _round_up(num_actions + 1, 8)      # narrow HBM slab width
    assert out_w <= OUT_PAD

    if B <= xla_batch_threshold:
        # Whole op would be a single pallas step dominated by fixed launch
        # cost; XLA's fused matmul+softmax is the right answer here.
        return _xla_forward(x, w1p, b1p, whp, bhp, num_actions)

    TB, B_pad, n_steps = _choose_tiles(B, max_batch_tile, megacore_batch)
    if B_pad != B:
        x = jnp.pad(x, ((0, B_pad - B), (0, 0)))

    kernel = functools.partial(actor_critic_kernel, num_actions=num_actions)
    slab = pl.pallas_call(
        kernel,
        out_shape=jax.ShapeDtypeStruct((B_pad, out_w), jnp.float32),
        grid_spec=pltpu.PrefetchScalarGridSpec(
            num_scalar_prefetch=0,
            grid=(n_steps,),
            in_specs=[
                pl.BlockSpec((TB, F), lambda i: (i, 0)),      # x: tiled over batch
                pl.BlockSpec(w1p.shape, lambda i: (0, 0)),    # weights: resident
                pl.BlockSpec(b1p.shape, lambda i: (0, 0)),    # (constant block idx
                pl.BlockSpec(whp.shape, lambda i: (0, 0)),    #  -> no re-DMA per
                pl.BlockSpec(bhp.shape, lambda i: (0, 0)),    #  grid step)
            ],
            out_specs=pl.BlockSpec((TB, out_w), lambda i: (i, 0)),
        ),
        compiler_params=pltpu.CompilerParams(
            # TODO(synk): benchmark pltpu.CORE_PARALLEL here on v7x.
            dimension_semantics=("parallel",)),
    )(x, w1p, b1p, whp, bhp)

    probs = slab[:B, :num_actions]
    values = slab[:B, num_actions:num_actions + 1]
    return probs, values


# --------------------------- parameter handling ---------------------------- #

def init_raw_params(key, num_inputs, hidden_size, num_actions):
    """PyTorch-style uniform(+-1/sqrt(fan_in)) init; weights stored as [in, out]."""
    k1, k2, k3, k4, k5, k6 = jax.random.split(key, 6)

    def lin(kw, kb, fan_in, fan_out):
        bound = 1.0 / jnp.sqrt(fan_in)
        w = jax.random.uniform(kw, (fan_in, fan_out), jnp.float32, -bound, bound)
        b = jax.random.uniform(kb, (1, fan_out), jnp.float32, -bound, bound)
        return w, b

    w1, b1 = lin(k1, k2, num_inputs, hidden_size)
    wa, ba = lin(k3, k4, hidden_size, num_actions)
    wv, bv = lin(k5, k6, hidden_size, 1)
    return w1, b1, wa, ba, wv, bv


def pack_params(w1, b1, wa, ba, wv, bv, *, fc1_dtype=jnp.bfloat16):
    """Fuse actor|critic heads and zero-pad to lane width (128) at init time.

    fc1 weight is cast to bf16 (MXU operand); the fused head weight stays f32
    (VMEM-resident + tiny -> full critic precision for free). Biases stay f32.
    """
    F, H = w1.shape
    A = wa.shape[1]
    H_pad = _round_up(H, 128)
    OUT_PAD = _round_up(A + 1, 128)

    w1p = jnp.zeros((F, H_pad), jnp.float32).at[:, :H].set(w1)
    b1p = jnp.zeros((1, H_pad), jnp.float32).at[:, :H].set(b1)

    whp = (jnp.zeros((H_pad, OUT_PAD), jnp.float32)
           .at[:H, :A].set(wa)
           .at[:H, A].set(wv[:, 0]))
    bhp = (jnp.zeros((1, OUT_PAD), jnp.float32)
           .at[:, :A].set(ba)
           .at[:, A].set(bv[:, 0]))

    return w1p.astype(fc1_dtype), b1p, whp, bhp


# --------------------------------- test ------------------------------------ #

def _reference(x, w1, b1, wa, ba, wv, bv, *, bf16_fc1=True):
    """Reference matching the kernel's precision (bf16 fc1 operands, f32 head)."""
    f32 = jnp.float32
    if bf16_fc1:
        xm = x.astype(jnp.bfloat16).astype(f32)
        w1m = w1.astype(jnp.bfloat16).astype(f32)
    else:
        xm, w1m = x, w1
    h = jnp.maximum(xm @ w1m + b1, 0.0)
    probs = jax.nn.softmax(h @ wa + ba, axis=-1)
    values = h @ wv + bv
    return probs, values


if __name__ == "__main__":
    num_inputs, hidden_size, num_actions = 16, 32, 4

    key = jax.random.PRNGKey(0)
    kx, kx2, kp = jax.random.split(key, 3)

    w1, b1, wa, ba, wv, bv = init_raw_params(kp, num_inputs, hidden_size,
                                             num_actions)
    w1p, b1p, whp, bhp = pack_params(w1, b1, wa, ba, wv, bv)

    # --- 1) Small batch, Pallas path forced (xla_batch_threshold=0) --------
    batch = 8
    x = jax.random.normal(kx, (batch, num_inputs), jnp.float32)
    probs, values = actor_critic_forward(x, w1p, b1p, whp, bhp, num_actions,
                                         xla_batch_threshold=0)
    jax.block_until_ready((probs, values))
    assert probs.shape == (batch, num_actions) and values.shape == (batch, 1)

    p_ref, v_ref = _reference(x, w1, b1, wa, ba, wv, bv, bf16_fc1=True)
    assert jnp.allclose(probs, p_ref, atol=2e-3), "probs mismatch (bf16-fc1 ref)"
    assert jnp.allclose(values, v_ref, atol=2e-3, rtol=2e-3), "values mismatch"
    assert jnp.allclose(jnp.sum(probs, axis=-1), 1.0, atol=1e-5)

    # Sanity vs exact f32 math (only bf16 fc1 rounding differs).
    p32, v32 = _reference(x, w1, b1, wa, ba, wv, bv, bf16_fc1=False)
    assert jnp.allclose(probs, p32, atol=5e-2)
    assert jnp.allclose(values, v32, atol=5e-2, rtol=5e-2)

    # --- 2) Larger, non-tile-aligned batch: multi-step grid + equalized tiles
    batch2 = 1032
    x2 = jax.random.normal(kx2, (batch2, num_inputs), jnp.float32)
    probs2, values2 = actor_critic_forward(x2, w1p, b1p, whp, bhp, num_actions,
                                           xla_batch_threshold=0)
    jax.block_until_ready((probs2, values2))
    assert probs2.shape == (batch2, num_actions) and values2.shape == (batch2, 1)
    p2_ref, v2_ref = _reference(x2, w1, b1, wa, ba, wv, bv, bf16_fc1=True)
    assert jnp.allclose(probs2, p2_ref, atol=2e-3)
    assert jnp.allclose(values2, v2_ref, atol=2e-3, rtol=2e-3)
    assert jnp.allclose(jnp.sum(probs2, axis=-1), 1.0, atol=1e-5)

    # --- 3) Default dispatch: small batch routes to the fused XLA path -----
    probs3, values3 = actor_critic_forward(x, w1p, b1p, whp, bhp, num_actions)
    jax.block_until_ready((probs3, values3))
    assert jnp.allclose(probs3, p_ref, atol=2e-3)
    assert jnp.allclose(values3, v_ref, atol=2e-3, rtol=2e-3)

    print("KERNEL_OK")
</pallas_src>

<mosaic_0001>
module attributes {stable_mosaic.version = 11 : i64} {
  func.func @actor_critic_kernel(%arg0: i32, %arg1: memref<8x16xf32, #tpu.memory_space<vmem>>, %arg2: memref<16x128xbf16, #tpu.memory_space<vmem>>, %arg3: memref<1x128xf32, #tpu.memory_space<vmem>>, %arg4: memref<128x128xf32, #tpu.memory_space<vmem>>, %arg5: memref<1x128xf32, #tpu.memory_space<vmem>>, %arg6: memref<8x8xf32, #tpu.memory_space<vmem>>) attributes {dimension_semantics = [#tpu.dimension_semantics<parallel>], iteration_bounds = array<i64: 1>, scalar_prefetch = 0 : i64, scratch_operands = 0 : i64, tpu.core_type = #tpu.core_type<tc>, window_params = [{transform_indices = @transform_0, window_bounds = array<i64: 8, 16>}, {pipeline_mode = #tpu.pipeline_mode<synchronous>, transform_indices = @transform_1, window_bounds = array<i64: 16, 128>}, {pipeline_mode = #tpu.pipeline_mode<synchronous>, transform_indices = @transform_2, window_bounds = array<i64: 1, 128>}, {pipeline_mode = #tpu.pipeline_mode<synchronous>, transform_indices = @transform_3, window_bounds = array<i64: 128, 128>}, {pipeline_mode = #tpu.pipeline_mode<synchronous>, transform_indices = @transform_4, window_bounds = array<i64: 1, 128>}, {transform_indices = @transform_5, window_bounds = array<i64: 8, 8>}]} {
    %c0 = arith.constant 0 : index
    %c0_0 = arith.constant 0 : index
    %0 = vector.load %arg1[%c0, %c0_0] : memref<8x16xf32, #tpu.memory_space<vmem>>, vector<8x16xf32>
    %1 = arith.truncf %0 : vector<8x16xf32> to vector<8x16xbf16>
    %c0_1 = arith.constant 0 : index
    %c0_2 = arith.constant 0 : index
    %2 = vector.load %arg2[%c0_1, %c0_2] : memref<16x128xbf16, #tpu.memory_space<vmem>>, vector<16x128xbf16>
    %cst = arith.constant dense<0.000000e+00> : vector<8x128xf32>
    %3 = tpu.matmul %1, %2, %cst {dimension_numbers = #tpu.dot_dimension_numbers<[1], [0], [0], [1], [0, 0, 1, 1], [], []>} : vector<8x16xbf16>, vector<16x128xbf16>, vector<8x128xf32> -> vector<8x128xf32>
    %c0_3 = arith.constant 0 : index
    %c0_4 = arith.constant 0 : index
    %4 = vector.load %arg3[%c0_3, %c0_4] : memref<1x128xf32, #tpu.memory_space<vmem>>, vector<1x128xf32>
    %5 = vector.broadcast %4 : vector<1x128xf32> to vector<8x128xf32>
    %6 = arith.addf %3, %5 : vector<8x128xf32>
    %cst_5 = arith.constant 0.000000e+00 : f32
    %7 = vector.broadcast %cst_5 : f32 to vector<8x128xf32>
    %8 = arith.maximumf %6, %7 : vector<8x128xf32>
    %c0_6 = arith.constant 0 : index
    %c0_7 = arith.constant 0 : index
    %9 = vector.load %arg4[%c0_6, %c0_7] : memref<128x128xf32, #tpu.memory_space<vmem>>, vector<128x128xf32>
    %cst_8 = arith.constant dense<0.000000e+00> : vector<8x128xf32>
    %10 = tpu.matmul %8, %9, %cst_8 {dimension_numbers = #tpu.dot_dimension_numbers<[1], [0], [0], [1], [0, 0, 1, 1], [], []>} : vector<8x128xf32>, vector<128x128xf32>, vector<8x128xf32> -> vector<8x128xf32>
    %c0_9 = arith.constant 0 : index
    %c0_10 = arith.constant 0 : index
    %11 = vector.load %arg5[%c0_9, %c0_10] : memref<1x128xf32, #tpu.memory_space<vmem>>, vector<1x128xf32>
    %12 = vector.broadcast %11 : vector<1x128xf32> to vector<8x128xf32>
    %13 = arith.addf %10, %12 : vector<8x128xf32>
    %14 = tpu.iota {dimensions = array<i32: 1>} : vector<8x128xi32>
    %c4_i32 = arith.constant 4 : i32
    %15 = vector.broadcast %c4_i32 : i32 to vector<8x128xi32>
    %16 = arith.cmpi slt, %14, %15 : vector<8x128xi32>
    %cst_11 = arith.constant -1.000000e+30 : f32
    %17 = vector.broadcast %cst_11 : f32 to vector<8x128xf32>
    %18 = arith.select %16, %13, %17 : vector<8x128xi1>, vector<8x128xf32>
    %cst_12 = arith.constant dense<0xFF800000> : vector<8xf32>
    %19 = vector.multi_reduction <maximumf>, %18, %cst_12 [1] : vector<8x128xf32> to vector<8xf32>
    %20 = vector.shape_cast %19 : vector<8xf32> to vector<8x1xf32>
    %21 = vector.broadcast %20 : vector<8x1xf32> to vector<8x128xf32>
    %22 = arith.subf %18, %21 : vector<8x128xf32>
    %23 = math.exp %22 : vector<8x128xf32>
    %cst_13 = arith.constant 0.000000e+00 : f32
    %24 = vector.broadcast %cst_13 : f32 to vector<8x128xf32>
    %25 = arith.select %16, %23, %24 : vector<8x128xi1>, vector<8x128xf32>
    %cst_14 = arith.constant dense<0.000000e+00> : vector<8xf32>
    %26 = vector.multi_reduction <add>, %25, %cst_14 [1] : vector<8x128xf32> to vector<8xf32>
    %27 = vector.shape_cast %26 : vector<8xf32> to vector<8x1xf32>
    %28 = vector.broadcast %27 : vector<8x1xf32> to vector<8x128xf32>
    %29 = arith.divf %25, %28 : vector<8x128xf32>
    %30 = arith.select %16, %29, %13 : vector<8x128xi1>, vector<8x128xf32>
    %31 = vector.extract_strided_slice %30 {offsets = [0, 0], sizes = [8, 8], strides = [1, 1]} : vector<8x128xf32> to vector<8x8xf32>
    %c0_15 = arith.constant 0 : index
    %c0_16 = arith.constant 0 : index
    %32 = vector.load %arg6[%c0_15, %c0_16] : memref<8x8xf32, #tpu.memory_space<vmem>>, vector<8x8xf32>
    tpu.vector_store %arg6[%c0_15, %c0_16], %31 {strides = array<i32>} : memref<8x8xf32, #tpu.memory_space<vmem>>, vector<8x8xf32>,
    return
  }
  func.func @transform_0(%arg0: i32) -> (i32, i32) {
    %c0_i32 = arith.constant 0 : i32
    %c0_i32_0 = arith.constant 0 : i32
    return %arg0, %c0_i32 : i32, i32
  }
  func.func @transform_1(%arg0: i32) -> (i32, i32) {
    %c0_i32 = arith.constant 0 : i32
    %c0_i32_0 = arith.constant 0 : i32
    %c0_i32_1 = arith.constant 0 : i32
    return %c0_i32, %c0_i32_0 : i32, i32
  }
  func.func @transform_2(%arg0: i32) -> (i32, i32) {
    %c0_i32 = arith.constant 0 : i32
    %c0_i32_0 = arith.constant 0 : i32
    %c0_i32_1 = arith.constant 0 : i32
    return %c0_i32, %c0_i32_0 : i32, i32
  }
  func.func @transform_3(%arg0: i32) -> (i32, i32) {
    %c0_i32 = arith.constant 0 : i32
    %c0_i32_0 = arith.constant 0 : i32
    %c0_i32_1 = arith.constant 0 : i32
    return %c0_i32, %c0_i32_0 : i32, i32
  }
  func.func @transform_4(%arg0: i32) -> (i32, i32) {
    %c0_i32 = arith.constant 0 : i32
    %c0_i32_0 = arith.constant 0 : i32
    %c0_i32_1 = arith.constant 0 : i32
    return %c0_i32, %c0_i32_0 : i32, i32
  }
  func.func @transform_5(%arg0: i32) -> (i32, i32) {
    %c0_i32 = arith.constant 0 : i32
    %c0_i32_0 = arith.constant 0 : i32
    return %arg0, %c0_i32 : i32, i32
  }
}

</mosaic_0001>

<bundles_post_ra>
// kernel: tpu_custom_call.1
= control target key start
LH: loop header
LB: loop body
LE: loop exit
PB: predicated region body
PF: predicated region fallthrough
CT: control target
= control target key end

     0   :  { %10 = vsyncpa [#allocation3], 0  ;;  %s545_s0 = inlined_call_operand.hbm [shape: f32[8,16], index: 0, kind: input, shape index: {}]   ;;  %s546_s1 = inlined_call_operand.hbm [shape: bf16[16,128], index: 1, kind: input, shape index: {}]   ;;  %s547_s2 = inlined_call_operand.vmem [shape: f32[1,128], index: 2, kind: input, shape index: {}]   ;;  %s548_s3 = inlined_call_operand.hbm [shape: f32[128,128], index: 3, kind: input, shape index: {}]   ;;  %s549_s4 = inlined_call_operand.vmem [shape: f32[1,128], index: 4, kind: input, shape index: {}]   ;;  %s550_s5 = inlined_call_operand.hbm [shape: f32[8,8], index: 5, kind: output, shape index: {}]  }
   0x1   :  { %11 = vsyncpa [#allocation6], 0 }
   0x2   :  { %12 = vsyncpa [#allocation4], 0  ;;  %s447_s18 = smov [#allocation5]   ;;  %s353_s22 = scalar_lea.hbm %s546_s1, 128 }
   0x3   :  { %s28_s19 = sshll.u32 %s447_s18, 4  ;;  %p354_p0 = scmp.ne.s32.totalorder %s546_s1, %s353_s22  ;;  %s29_s19 = int_to_ptr.vmem [resolvable:$true] %s28_s19 }
   0x4   :  { %p357_p1 = scmp.lt.u32.totalorder %s353_s22, %s546_s1 }
   0x6   :  { %p359_p2 = pnand %p357_p1, %p354_p0 }
   0x8   :  { %362 = shalt.err (!%p359_p2)
}
   0x9   :  { %s363_s27 = scalar_lea.vmem %s29_s19, 128  ;;  %p368_p4 = scmp.lt.s32.totalorder %s29_s19, %s29_s19 }
   0xa   :  { %p364_p3 = scmp.ne.s32.totalorder %s29_s19, %s363_s27  ;;  %p369_p5 = scmp.lt.s32.totalorder %s363_s27, %s363_s27 }
   0xc   :  { %p370_p6 = por %p369_p5, %p368_p4 }
   0xe   :  { %p371_p7 = pnand %p370_p6, %p364_p3 }
  0x10   :  { %374 = shalt.err (!%p371_p7)
}
  0x11   :  { %s448_s28 = smov 64   ;;  %s449_s29 = smov 4  }
  0x12   :  { %34 = dma.hbm_to_vmem [thread:$0]  %s546_s1, 128, %s29_s19, [#allocation6], %s448_s28, %s448_s28, %s449_s29  }
  0x13   :  { %s450_s7 = smov [#allocation2]   ;;  %s451_s9 = smov [#allocation7]  }
  0x14   :  { %s19_s8 = sshll.u32 %s450_s7, 4  ;;  %s42_s10 = sshll.u32 %s451_s9, 4  ;;  %s20_s8 = int_to_ptr.vmem [resolvable:$true] %s19_s8  ;;  %s43_s10 = int_to_ptr.vmem [resolvable:$true] %s42_s10 }
  0x15   :  { %s375_s13 = scalar_lea.hbm %s545_s0, 128 }
  0x16   :  { %p376_p8 = scmp.ne.s32.totalorder %s545_s0, %s375_s13  ;;  %p379_p9 = scmp.lt.u32.totalorder %s375_s13, %s545_s0 }
  0x18   :  { %p381_p10 = pnand %p379_p9, %p376_p8 }
  0x1a   :  { %384 = shalt.err (!%p381_p10)
}
  0x1b   :  { %s385_s1 = scalar_lea.vmem %s20_s8, 128  ;;  %p390_p12 = scmp.lt.s32.totalorder %s20_s8, %s20_s8 }
  0x1c   :  { %p386_p11 = scmp.ne.s32.totalorder %s20_s8, %s385_s1  ;;  %p391_p13 = scmp.lt.s32.totalorder %s385_s1, %s385_s1 }
  0x1e   :  { %p392_p0 = por %p391_p13, %p390_p12 }
  0x20   :  { %p393_p1 = pnand %p392_p0, %p386_p11 }
  0x22   :  { %396 = shalt.err (!%p393_p1)
}
  0x23   :  { %22 = dma.hbm_to_vmem [thread:$0]  %s545_s0, 128, %s20_s8, [#allocation3]  }
  0x24   :  { %s397_s22 = scalar_lea.hbm %s548_s3, 2048 }
  0x25   :  { %p398_p2 = scmp.ne.s32.totalorder %s548_s3, %s397_s22  ;;  %p401_p3 = scmp.lt.u32.totalorder %s397_s22, %s548_s3 }
  0x27   :  { %p403_p4 = pnand %p401_p3, %p398_p2 }
  0x29   :  { %406 = shalt.err (!%p403_p4)
}
  0x2a   :  { %s407_s27 = scalar_lea.vmem %s43_s10, 2048  ;;  %p412_p6 = scmp.lt.s32.totalorder %s43_s10, %s43_s10 }
  0x2b   :  { %p408_p5 = scmp.ne.s32.totalorder %s43_s10, %s407_s27  ;;  %p413_p7 = scmp.lt.s32.totalorder %s407_s27, %s407_s27 }
  0x2d   :  { %p414_p8 = por %p413_p7, %p412_p6 }
  0x2f   :  { %p415_p9 = pnand %p414_p8, %p408_p5 }
  0x31   :  { %418 = shalt.err (!%p415_p9)
}
  0x32   :  { %s452_s0 = smov 128   ;;  %s453_s28 = smov 8  }
  0x33   :  { %48 = dma.hbm_to_vmem [thread:$0]  %s548_s3, 2048, %s43_s10, [#allocation6], %s452_s0, %s452_s0, %s453_s28  }
  0x34   :  { %441 = dma.done.wait [#allocation3], 128  }
  0x35   :  { %442 = vsyncadd [#allocation3], 4294967168 }
  0x36   :  { %443 = dma.done.wait [#allocation6], 2176  }
  0x37   :  { %444 = vsyncadd [#allocation6], 4294965120  ;;  %v454_v0 = vmov 0.0   ;;  %vm455_vm0 = vmmov 0   ;;  %v456_v1 = vmov 0.0|0.0   ;;  %v348_v2 = vld [vmem:[#allocation5] sm:$0xff]   ;;  %v216_v36 = vlaneseq }
  0x38   :  { %272 = vmatprep.subr.bf16.mxu0 %v454_v0  ;;  %274 = vmatprep.mubr.msk.bf16.mxu0 %vm455_vm0, %v454_v0  ;;  %v61_v3 = vld [vmem:[#allocation2] sm:$0xff]  ;;  %v123_v4 = vld [vmem:[#allocation7] sm:$0xff]  ;;  %v124_v5 = vld [vmem:[#allocation7 + $0x8] sm:$0xff]  ;;  %vm78_vm1 = vcmask 130048   ;;  %vm231_vm3 = vcmask 64512  }
  0x39   :  { %313 = vmatprep.subr.bf16.mxu1 %v456_v1  ;;  %310 = vmatprep.mubr.msk.f32.mxu1 %vm455_vm0, %v454_v0  ;;  %v62_v6 = vpack.c.bf16 %v61_v3, %v61_v3  ;;  %v314_v7 = vpack.c.bf16 %v124_v5, %v123_v4  ;;  %v125_v8 = vld [vmem:[#allocation7 + $0x10] sm:$0xff]  ;;  %v126_v9 = vld [vmem:[#allocation7 + $0x18] sm:$0xff]  ;;  %v127_v11 = vld [vmem:[#allocation7 + $0x20] sm:$0xff]  ;;  %v217_v37 = vand.u32 127, %v216_v36 }
  0x3a   :  { %273 = vmatpush3.bf16.msra.mxu0 %v348_v2  ;;  %v317_v10 = vpack.c.bf16 %v126_v9, %v125_v8  ;;  %v128_v12 = vld [vmem:[#allocation7 + $0x28] sm:$0xff]  ;;  %v129_v14 = vld [vmem:[#allocation7 + $0x30] sm:$0xff]  ;;  %v130_v15 = vld [vmem:[#allocation7 + $0x38] sm:$0xff] }
  0x3b   :  { %315 = vmatpush3.bf16.msra.mxu1 %v314_v7  ;;  %v320_v13 = vpack.c.bf16 %v128_v12, %v127_v11  ;;  %v323_v16 = vpack.c.bf16 %v130_v15, %v129_v14  ;;  %v131_v17 = vld [vmem:[#allocation7 + $0x40] sm:$0xff]  ;;  %v132_v18 = vld [vmem:[#allocation7 + $0x48] sm:$0xff]  ;;  %v133_v20 = vld [vmem:[#allocation7 + $0x50] sm:$0xff]  ;;  %vm218_vm2 = vcmp.lt.s32.totalorder %v217_v37, 4 }
  0x3c   :  { %316 = vmatprep.subr.bf16.mxu1 %v456_v1  ;;  %v326_v19 = vpack.c.bf16 %v132_v18, %v131_v17  ;;  %v134_v21 = vld [vmem:[#allocation7 + $0x58] sm:$0xff]  ;;  %v135_v23 = vld [vmem:[#allocation7 + $0x60] sm:$0xff]  ;;  %v136_v24 = vld [vmem:[#allocation7 + $0x68] sm:$0xff] }
  0x3d   :  { %275 = vmatmul.mubr.msk.bf16.vlgmr.msra.gmra.mrb[0].mxu0 %vm78_vm1, %v62_v6  ;;  %v329_v22 = vpack.c.bf16 %v134_v21, %v133_v20  ;;  %v332_v25 = vpack.c.bf16 %v136_v24, %v135_v23  ;;  %v137_v26 = vld [vmem:[#allocation7 + $0x70] sm:$0xff]  ;;  %v138_v27 = vld [vmem:[#allocation7 + $0x78] sm:$0xff] }
  0x3e   :  { %v335_v28 = vpack.c.bf16 %v138_v27, %v137_v26  ;;  %v249_v29 = vld [vmem:[%s547_s2] ss:$0 sm:$0xff]  ;;  %s457_s2 = smov [#allocation8]  }
  0x3f   :  { %318 = vmatpush3.bf16.msra.mxu1 %v317_v10  ;;  %v252_v38 = vld [vmem:[%s549_s4] ss:$0 sm:$0xff]  ;;  %s239_s9 = sshll.u32 %s457_s2, 4  ;;  %s240_s9 = int_to_ptr.vmem [resolvable:$true] %s239_s9 }
  0x40   :  { %319 = vmatprep.subr.bf16.mxu1 %v456_v1  ;;  %s419_s4 = scalar_lea.vmem %s240_s9, 128  ;;  %p424_p11 = scmp.lt.s32.totalorder %s240_s9, %s240_s9 }
  0x41   :  { %p420_p10 = scmp.ne.s32.totalorder %s240_s9, %s419_s4  ;;  %p425_p12 = scmp.lt.s32.totalorder %s419_s4, %s419_s4 }
  0x43   :  { %321 = vmatpush3.bf16.msra.mxu1 %v320_v13  ;;  %p426_p13 = por %p425_p12, %p424_p11 }
  0x44   :  { %322 = vmatprep.subr.bf16.mxu1 %v456_v1 }
  0x45   :  { %p427_p0 = pnand %p426_p13, %p420_p10 }
  0x47   :  { %324 = vmatpush3.bf16.msra.mxu1 %v323_v16 }
  0x48   :  { %325 = vmatprep.subr.bf16.mxu1 %v456_v1 }
  0x4b   :  { %327 = vmatpush3.bf16.msra.mxu1 %v326_v19 }
  0x4c   :  { %328 = vmatprep.subr.bf16.mxu1 %v456_v1 }
  0x4f   :  { %330 = vmatpush3.bf16.msra.mxu1 %v329_v22 }
  0x50   :  { %331 = vmatprep.subr.bf16.mxu1 %v456_v1 }
  0x53   :  { %333 = vmatpush3.bf16.msra.mxu1 %v332_v25 }
  0x54   :  { %334 = vmatprep.subr.bf16.mxu1 %v456_v1 }
  0x57   :  { %336 = vmatpush3.bf16.msra.mxu1 %v335_v28 }
 0x110   :  { %v116_v30 = vpop.f32.mrb[0].mxu0 }
 0x111   :  { %v117_v31 = vadd.f32 %v249_v29, %v116_v30  ;;  %v276_v32 = vpop.f32.mrb[1].mxu0 }
 0x112   :  { %v119_v33 = vpop.f32.mrb[2].mxu0 }
 0x113   :  { %v122_v34 = vmax.f32 %v117_v31, 0.0  ;;  %v277_v35 = vpop.f32.mrb[3].mxu0 }
 0x115   :  { %311 = vmatmul.mubr.f32.vlgmr.msra.gmra.mrb[0].mxu1 %v122_v34 }
 0x1e8   :  { %v212_v39 = vpop.f32.mrb[0].mxu1 }
 0x1e9   :  { %v213_v40 = vadd.f32 %v252_v38, %v212_v39  ;;  %v312_v41 = vpop.f32.mrb[1].mxu1 }
 0x1eb   :  { %v219_v42 = vsel %vm218_vm2, %v213_v40, -1e+30 }
 0x1ec   :  { %220 = vmax.xlane.f32.xlu0 %v219_v42 }
 0x279   :  { %v221_v43 = vpop.xlane.xlu0 %220 }
 0x27a   :  { %v222_v44 = vsub.f32 %v219_v42, %v221_v43 }
 0x27c   :  { %v223_v45 = vmul.f32 1.442695, %v222_v44 }
 0x27e   :  { %349 = vpow2.f32 %v223_v45 }
 0x288   :  { %v350_v46 = vpop.eup %349 }
 0x289   :  { %v225_v47 = vsel %vm218_vm2, %v350_v46, 0.0 }
 0x28a   :  { %226 = vadd.xlane.f32.xlu0 %v225_v47 }
 0x317   :  { %v227_v48 = vpop.xlane.xlu0 %226 }
 0x318   :  { %351 = vrcp.f32 %v227_v48 }
 0x322   :  { %v352_v49 = vpop.eup %351 }
 0x323   :  { %v229_v50 = vmul.f32 %v352_v49, %v225_v47 }
 0x325   :  { %v230_v51 = vsel %vm218_vm2, %v229_v50, %v213_v40 }
 0x326   :  { %232 = vst.msk [vmem:[#allocation8] sm:$0xff] %vm231_vm3, %v230_v51 }
 0x327   :  { %430 = shalt.err (!%p427_p0)
}
 0x328   :  { %s431_s12 = scalar_lea.hbm %s550_s5, 128 }
 0x329   :  { %p432_p1 = scmp.ne.s32.totalorder %s550_s5, %s431_s12  ;;  %p435_p2 = scmp.lt.u32.totalorder %s431_s12, %s550_s5 }
 0x32b   :  { %p437_p3 = pnand %p435_p2, %p432_p1 }
 0x32d   :  { %440 = shalt.err (!%p437_p3)
}
 0x32e   :  { %242 = dma.vmem_to_hbm [thread:$0]  %s240_s9, 128, %s550_s5, [#allocation4]  }
 0x32f   :  { %445 = dma.done.wait [#allocation4], 128  }
 0x330   :  { %446 = vsyncadd [#allocation4], 4294967168 }
 0x331   :  { %246 = vsyncpa [#allocation3], 1 }
 0x332   :  { %247 = vsyncpa [#allocation6], 1 }
 0x333   :  { %248 = vsyncpa [#allocation4], 1 }

</bundles_post_ra>
